<compile_context>
chip_gen: v7x
topology: tpu7x:2x2x1
jax: 0.10.0
libtpu: 0.0.40
codegen_flags: <defaults>
</compile_context>

<pallas_src>
import functools
import math

import jax
import jax.numpy as jnp
from jax import lax
from jax.experimental import pallas as pl
from jax.experimental.pallas import tpu as pltpu


# ----------------------------------------------------------------------------
# Helpers
# ----------------------------------------------------------------------------

def _choose_row_tile(n_rows, per_row_bytes, resident_bytes,
                     budget_bytes=24 * 1024 * 1024):
    """Pick a batch tile: full batch if it fits, else the largest multiple of 8
    (capped at 1024) whose double-buffered working set stays inside a VMEM
    budget that is valid for v5e/v6e/v7x default scoped limits."""
    avail = budget_bytes - 2 * resident_bytes
    max_rows = avail // (2 * max(per_row_bytes, 1))
    if n_rows <= max(8, min(1024, max_rows)):
        return n_rows                      # single block == full dim (no (8,128) issue)
    tn = min(1024, max_rows)
    return max(8, (tn // 8) * 8)


def _affine(x_f32, w_ref, b_ref):
    """y = x @ W^T + b with W in torch (out, in) layout; f32 MXU accumulate."""
    w = w_ref[...].astype(jnp.float32)     # (C, F)
    b = b_ref[...].astype(jnp.float32)     # (1, C)
    y = lax.dot_general(x_f32, w, (((1,), (1,)), ((), ())),
                        preferred_element_type=jnp.float32)
    return y + b


def _elu(y):
    # F.elu, alpha=1.0 (min() keeps exp() finite on the discarded branch)
    return jnp.where(y > 0, y, jnp.exp(jnp.minimum(y, 0.0)) - 1.0)


# ----------------------------------------------------------------------------
# Fused forward kernel: [sandwich linear] + all classifier heads
# ----------------------------------------------------------------------------

def _fused_heads_kernel(*refs, num_heads, has_sandwich, cascade):
    # refs: x, [ws, bs], (w_i, b_i) * num_heads, out_i * num_heads
    idx = 0
    x_ref = refs[idx]; idx += 1
    feats = x_ref[...].astype(jnp.float32)                 # (TN, F) -> f32 compute
    if has_sandwich:
        feats = _affine(feats, refs[idx], refs[idx + 1])
        idx += 2
    head_refs = refs[idx: idx + 2 * num_heads]
    out_refs = refs[idx + 2 * num_heads:]
    for i in range(num_heads):
        y = _affine(feats, head_refs[2 * i], head_refs[2 * i + 1])
        out_refs[i][...] = y.astype(out_refs[i].dtype)
        if cascade and i != num_heads - 1:
            feats = _elu(y)                                 # stays in vregs/VMEM


def multi_target_heads_forward(x, head_params, *, sandwich_params=None,
                               cascade=False):
    """x: (N, F) features (native dtype). head_params: list of (W(C,Fprev), b(C,)).
    Returns list of (N, C_i) head outputs, computed in a single Pallas kernel."""
    n, f = int(x.shape[0]), int(x.shape[1])
    num_heads = len(head_params)
    dtype = x.dtype
    itemsize = jnp.dtype(dtype).itemsize
    out_cols = [int(w.shape[0]) for (w, _) in head_params]

    # --- batch tile sized against a cross-generation VMEM budget ---
    resident_bytes = 0
    if sandwich_params is not None:
        resident_bytes += int(sandwich_params[0].size + sandwich_params[1].size) * itemsize
    for (w, b) in head_params:
        resident_bytes += int(w.size + b.size) * itemsize
    per_row_bytes = (f + sum(out_cols)) * itemsize
    tn = _choose_row_tile(n, per_row_bytes, resident_bytes)
    grid = (pl.cdiv(n, tn),)

    inputs = [x]
    in_specs = [pl.BlockSpec((tn, f), lambda i: (i, 0))]
    if sandwich_params is not None:
        ws, bs = sandwich_params
        inputs += [ws, bs.reshape(1, -1)]
        in_specs += [pl.BlockSpec(ws.shape, lambda i: (0, 0)),
                     pl.BlockSpec((1, int(bs.shape[0])), lambda i: (0, 0))]
    for (w, b) in head_params:
        inputs += [w, b.reshape(1, -1)]
        in_specs += [pl.BlockSpec(w.shape, lambda i: (0, 0)),
                     pl.BlockSpec((1, int(b.shape[0])), lambda i: (0, 0))]

    out_shape = tuple(jax.ShapeDtypeStruct((n, c), dtype) for c in out_cols)
    out_specs = tuple(pl.BlockSpec((tn, c), lambda i: (i, 0)) for c in out_cols)

    # advisory cost hint so XLA can overlap this custom call with its neighbors
    flops = 0
    bytes_accessed = n * f * itemsize + n * sum(out_cols) * itemsize
    mats = ([sandwich_params] if sandwich_params is not None else []) + list(head_params)
    for w, b in mats:
        flops += 2 * n * int(w.shape[0]) * int(w.shape[1])
        bytes_accessed += int(w.size + b.size) * itemsize
    transcendentals = n * sum(out_cols[:-1]) if cascade else 0

    kernel = functools.partial(_fused_heads_kernel, num_heads=num_heads,
                               has_sandwich=sandwich_params is not None,
                               cascade=cascade)
    outs = pl.pallas_call(
        kernel,
        grid=grid,
        in_specs=in_specs,
        out_specs=out_specs,
        out_shape=out_shape,
        compiler_params=pltpu.CompilerParams(
            dimension_semantics=("parallel",),
            vmem_limit_bytes=32 * 1024 * 1024),
        cost_estimate=pl.CostEstimate(flops=int(flops),
                                      transcendentals=int(transcendentals),
                                      bytes_accessed=int(bytes_accessed)),
    )(*inputs)
    return list(outs)


# ----------------------------------------------------------------------------
# Module classes mirroring the PyTorch spec
# ----------------------------------------------------------------------------

def _linear_init(key, out_features, in_features, dtype=jnp.float32):
    """torch.nn.Linear default init: U(-1/sqrt(fan_in), 1/sqrt(fan_in))."""
    kw, kb = jax.random.split(key)
    bound = 1.0 / math.sqrt(in_features)
    w = jax.random.uniform(kw, (out_features, in_features), dtype, -bound, bound)
    b = jax.random.uniform(kb, (out_features,), dtype, -bound, bound)
    return w, b


class MultiTargetLayer:
    def __init__(self, key, num_features, num_class_list, dtype=jnp.float32):
        assert isinstance(num_class_list, list)
        self.num_features = num_features
        keys = jax.random.split(key, len(num_class_list))
        self.params = [_linear_init(k, nc, num_features, dtype)
                       for k, nc in zip(keys, num_class_list)]

    def __call__(self, x):
        return multi_target_heads_forward(x, self.params, cascade=False)


class MultiTargetCascadeLayer:
    def __init__(self, key, num_features, num_class_list, dtype=jnp.float32):
        assert isinstance(num_class_list, list)
        self.num_features = num_features
        keys = jax.random.split(key, len(num_class_list))
        params, prev = [], num_features
        for k, nc in zip(keys, num_class_list):
            params.append(_linear_init(k, nc, prev, dtype))
            prev = nc
        self.params = params

    def __call__(self, x):
        return multi_target_heads_forward(x, self.params, cascade=True)


class _StubBackbone:
    """Minimal stand-in for the external timm-style backbone expected by
    MultiTargetModel. forward_features = global average pool over H, W."""
    # TODO(synk): the real backbone (arbitrary CNN/ViT) has no single Pallas
    # equivalent here; features are produced by this stub outside the kernel.

    def __init__(self, num_features):
        self.num_features = num_features

    def reset_classifier(self, num_classes=0):
        pass

    def forward_features(self, x):          # (N, C, H, W) -> (N, C)
        return jnp.mean(x, axis=(2, 3))


class MultiTargetModel:
    """JAX/Pallas port of the PyTorch MultiTargetModel forward pass."""

    def __init__(self, model, num_class_list, sandwich=True, cascade=False,
                 key=None, dtype=jnp.float32):
        self.model = model
        self.model.reset_classifier(num_classes=0)
        key = jax.random.PRNGKey(0) if key is None else key
        k_s, k_c = jax.random.split(key)
        f = model.num_features
        self.sandwich = _linear_init(k_s, f, f, dtype) if sandwich else None
        self.cascade_flag = cascade
        if cascade:
            self.classifiers = MultiTargetCascadeLayer(k_c, f, num_class_list, dtype)
        else:
            self.classifiers = MultiTargetLayer(k_c, f, num_class_list, dtype)

    def __call__(self, x):
        feats = self.model.forward_features(x)
        # sandwich linear + every classifier head run inside ONE Pallas kernel
        return multi_target_heads_forward(feats, self.classifiers.params,
                                          sandwich_params=self.sandwich,
                                          cascade=self.cascade_flag)


# ----------------------------------------------------------------------------
# MultiTargetLoss: batch-tiled multi-head cross-entropy kernel
# ----------------------------------------------------------------------------

def _ce_partial_kernel(logits_ref, targets_ref, out_ref, *, n_total, block_rows):
    # logits_ref: (1, TN, C) native dtype ; targets_ref: (1, TN, 1) int32
    # out_ref:    (1, 1) f32 partial NLL sum over the valid rows of this tile
    logits = logits_ref[0].astype(jnp.float32)                  # cast inside kernel
    tgt = targets_ref[0]                                        # (TN, 1)

    m = jnp.max(logits, axis=-1, keepdims=True)
    shifted = logits - m                                        # raw logits die here
    sumexp = jnp.sum(jnp.exp(shifted), axis=-1, keepdims=True)

    # pick logit[n, tgt[n]] from the *shifted* tensor (the m terms cancel).
    # Note: out-of-range targets (e.g. ignore_index=-100) are not supported.
    col = lax.broadcasted_iota(jnp.int32, shifted.shape, 1)
    picked = jnp.sum(jnp.where(col == tgt, shifted, 0.0), axis=-1, keepdims=True)

    losses = jnp.log(sumexp) - picked                           # (TN, 1)

    # mask rows past the true batch (ragged last tile)
    row = lax.broadcasted_iota(jnp.int32, losses.shape, 0) + pl.program_id(1) * block_rows
    losses = jnp.where(row < n_total, losses, 0.0)

    out_ref[...] = jnp.broadcast_to(jnp.sum(losses), (1, 1))


def cross_entropy_per_head(logits, targets):
    """logits: (K, N, C) (native dtype), targets: (K, N) int -> (K,) f32 mean CE."""
    K, N, C = (int(s) for s in logits.shape)
    t = targets.reshape(K, N, 1).astype(jnp.int32)
    itemsize = jnp.dtype(logits.dtype).itemsize

    tn = _choose_row_tile(N, C * itemsize + 4, 0)
    n_tiles = pl.cdiv(N, tn)

    kernel = functools.partial(_ce_partial_kernel, n_total=N, block_rows=tn)
    partial_sums = pl.pallas_call(
        kernel,
        out_shape=jax.ShapeDtypeStruct((K, n_tiles), jnp.float32),
        grid=(K, n_tiles),
        in_specs=[
            pl.BlockSpec((1, tn, C), lambda k, j: (k, j, 0)),
            pl.BlockSpec((1, tn, 1), lambda k, j: (k, j, 0)),
        ],
        out_specs=pl.BlockSpec((1, 1), lambda k, j: (k, j)),
        compiler_params=pltpu.CompilerParams(
            dimension_semantics=("parallel", "parallel"),
            vmem_limit_bytes=32 * 1024 * 1024),
        cost_estimate=pl.CostEstimate(
            flops=int(4 * K * N * C),
            transcendentals=int(K * N * C),
            bytes_accessed=int(K * N * C * itemsize + K * N * 4 + K * n_tiles * 4)),
    )(logits, t)                                   # no wrapper f32 upcast
    # normalize by the TRUE batch size in the epilogue (not the block size)
    return jnp.sum(partial_sums, axis=1) * (1.0 / N)


class MultiTargetLoss:
    """JAX/Pallas port of the PyTorch MultiTargetLoss (loss_fn = CrossEntropyLoss).
    Assumes every head has the same class count (as in the demo) so heads fold
    into one Pallas launch."""

    def __init__(self, learnable=0, fixed_scales=None, primary_scale=0.0):
        self.learnable = learnable
        self.fixed_scales = fixed_scales
        self.primary_scale = primary_scale
        if learnable:
            self.log_var = [jnp.zeros((1,), jnp.float32) for _ in range(learnable)]

    def __call__(self, inputs, targets):
        logits = jnp.stack(inputs, axis=0)            # (K, N, C) native dtype
        tgts = jnp.stack(targets, axis=0)             # (K, N)
        ce = cross_entropy_per_head(logits, tgts)     # (K,) per-head mean CE (Pallas)

        if self.learnable:
            # TODO(synk): the reference's primary_scale branch calls loss_fn with a
            # single argument (ill-defined); not reproduced here.
            losses = [jnp.exp(-lv) * ce[i] + lv for i, lv in enumerate(self.log_var)]
            return jnp.mean(jnp.concatenate(losses))
        n = len(inputs)
        scales = self.fixed_scales if self.fixed_scales else [1.0 / n] * n
        return sum(s * ce[i] for i, s in enumerate(scales))


def _reference_loss(inputs, targets):
    """Pure-JAX reference for the default (non-learnable) loss path."""
    n = len(inputs)
    total = 0.0
    for x, t in zip(inputs, targets):
        logp = jax.nn.log_softmax(x.astype(jnp.float32), axis=-1)
        nll = -jnp.take_along_axis(logp, t[:, None].astype(jnp.int32), axis=-1)[:, 0]
        total = total + (1.0 / n) * jnp.mean(nll)
    return total


# ----------------------------------------------------------------------------
# Demo / correctness checks
# ----------------------------------------------------------------------------

if __name__ == "__main__":
    root = jax.random.PRNGKey(0)
    k_x, k_m1, k_m2, k_logits, k_tgt = jax.random.split(root, 5)
    hp = lax.Precision.HIGHEST

    # ---------------- MultiTargetModel forward (the spec) ----------------
    N, C_in, H, W = 2, 32, 8, 8
    num_class_list = [16, 8, 4]
    x = jax.random.normal(k_x, (N, C_in, H, W), jnp.float32)

    backbone = _StubBackbone(num_features=C_in)
    feats = backbone.forward_features(x)

    # parallel heads with sandwich linear
    model = MultiTargetModel(backbone, num_class_list, sandwich=True,
                             cascade=False, key=k_m1)
    outs = jax.block_until_ready(model(x))
    ws, bs = model.sandwich
    ref_feats = jnp.dot(feats, ws.T, precision=hp) + bs
    for (w, b), o in zip(model.classifiers.params, outs):
        ref = jnp.dot(ref_feats, w.T, precision=hp) + b
        assert o.shape == ref.shape
        assert jnp.allclose(o, ref, rtol=1e-3, atol=1e-3), (o, ref)

    # cascade heads, no sandwich
    model_c = MultiTargetModel(backbone, num_class_list, sandwich=False,
                               cascade=True, key=k_m2)
    outs_c = jax.block_until_ready(model_c(x))
    h = feats
    for i, ((w, b), o) in enumerate(zip(model_c.classifiers.params, outs_c)):
        y = jnp.dot(h, w.T, precision=hp) + b
        assert jnp.allclose(o, y, rtol=1e-3, atol=1e-3), (i, o, y)
        if i != len(num_class_list) - 1:
            h = jnp.where(y > 0, y, jnp.exp(jnp.minimum(y, 0.0)) - 1.0)

    # ---------------- MultiTargetLoss (multi-head cross-entropy) ----------------
    K, Nb, C = 3, 8, 128
    lkeys = jax.random.split(k_logits, K)
    tkeys = jax.random.split(k_tgt, K)
    loss_inputs = [jax.random.normal(lkeys[i], (Nb, C), jnp.float32) for i in range(K)]
    loss_targets = [jax.random.randint(tkeys[i], (Nb,), 0, C, dtype=jnp.int32)
                    for i in range(K)]

    loss_mod = MultiTargetLoss()                       # equal 1/n fixed scales
    loss = jax.block_until_ready(loss_mod(loss_inputs, loss_targets))
    ref_loss = _reference_loss(loss_inputs, loss_targets)
    assert jnp.allclose(loss, ref_loss, rtol=1e-4, atol=1e-4), (loss, ref_loss)

    loss_learn = MultiTargetLoss(learnable=K)          # learnable log-var weighting
    loss2 = jax.block_until_ready(loss_learn(loss_inputs, loss_targets))
    assert jnp.isfinite(loss2)

    print("KERNEL_OK")
</pallas_src>

<mosaic_0001>
module attributes {stable_mosaic.version = 11 : i64} {
  func.func @_fused_heads_kernel(%arg0: i32, %arg1: memref<2x32xf32, #tpu.memory_space<vmem>>, %arg2: memref<32x32xf32, #tpu.memory_space<vmem>>, %arg3: memref<1x32xf32, #tpu.memory_space<vmem>>, %arg4: memref<16x32xf32, #tpu.memory_space<vmem>>, %arg5: memref<1x16xf32, #tpu.memory_space<vmem>>, %arg6: memref<8x32xf32, #tpu.memory_space<vmem>>, %arg7: memref<1x8xf32, #tpu.memory_space<vmem>>, %arg8: memref<4x32xf32, #tpu.memory_space<vmem>>, %arg9: memref<1x4xf32, #tpu.memory_space<vmem>>, %arg10: memref<2x16xf32, #tpu.memory_space<vmem>>, %arg11: memref<2x8xf32, #tpu.memory_space<vmem>>, %arg12: memref<2x4xf32, #tpu.memory_space<vmem>>) attributes {dimension_semantics = [#tpu.dimension_semantics<parallel>], iteration_bounds = array<i64: 1>, scalar_prefetch = 0 : i64, scratch_operands = 0 : i64, tpu.core_type = #tpu.core_type<tc>, window_params = [{transform_indices = @transform_0, window_bounds = array<i64: 2, 32>}, {pipeline_mode = #tpu.pipeline_mode<synchronous>, transform_indices = @transform_1, window_bounds = array<i64: 32, 32>}, {pipeline_mode = #tpu.pipeline_mode<synchronous>, transform_indices = @transform_2, window_bounds = array<i64: 1, 32>}, {pipeline_mode = #tpu.pipeline_mode<synchronous>, transform_indices = @transform_3, window_bounds = array<i64: 16, 32>}, {pipeline_mode = #tpu.pipeline_mode<synchronous>, transform_indices = @transform_4, window_bounds = array<i64: 1, 16>}, {pipeline_mode = #tpu.pipeline_mode<synchronous>, transform_indices = @transform_5, window_bounds = array<i64: 8, 32>}, {pipeline_mode = #tpu.pipeline_mode<synchronous>, transform_indices = @transform_6, window_bounds = array<i64: 1, 8>}, {pipeline_mode = #tpu.pipeline_mode<synchronous>, transform_indices = @transform_7, window_bounds = array<i64: 4, 32>}, {pipeline_mode = #tpu.pipeline_mode<synchronous>, transform_indices = @transform_8, window_bounds = array<i64: 1, 4>}, {transform_indices = @transform_9, window_bounds = array<i64: 2, 16>}, {transform_indices = @transform_10, window_bounds = array<i64: 2, 8>}, {transform_indices = @transform_11, window_bounds = array<i64: 2, 4>}]} {
    %c0 = arith.constant 0 : index
    %c0_0 = arith.constant 0 : index
    %0 = vector.load %arg1[%c0, %c0_0] : memref<2x32xf32, #tpu.memory_space<vmem>>, vector<2x32xf32>
    %c0_1 = arith.constant 0 : index
    %c0_2 = arith.constant 0 : index
    %1 = vector.load %arg2[%c0_1, %c0_2] : memref<32x32xf32, #tpu.memory_space<vmem>>, vector<32x32xf32>
    %c0_3 = arith.constant 0 : index
    %c0_4 = arith.constant 0 : index
    %2 = vector.load %arg3[%c0_3, %c0_4] : memref<1x32xf32, #tpu.memory_space<vmem>>, vector<1x32xf32>
    %cst = arith.constant dense<0.000000e+00> : vector<2x32xf32>
    %3 = tpu.matmul %0, %1, %cst {dimension_numbers = #tpu.dot_dimension_numbers<[1], [1], [0], [0], [0, 0, 1, 0], [], []>} : vector<2x32xf32>, vector<32x32xf32>, vector<2x32xf32> -> vector<2x32xf32>
    %4 = vector.broadcast %2 : vector<1x32xf32> to vector<2x32xf32>
    %5 = arith.addf %3, %4 : vector<2x32xf32>
    %c0_5 = arith.constant 0 : index
    %c0_6 = arith.constant 0 : index
    %6 = vector.load %arg4[%c0_5, %c0_6] : memref<16x32xf32, #tpu.memory_space<vmem>>, vector<16x32xf32>
    %c0_7 = arith.constant 0 : index
    %c0_8 = arith.constant 0 : index
    %7 = vector.load %arg5[%c0_7, %c0_8] : memref<1x16xf32, #tpu.memory_space<vmem>>, vector<1x16xf32>
    %cst_9 = arith.constant dense<0.000000e+00> : vector<2x16xf32>
    %8 = tpu.matmul %5, %6, %cst_9 {dimension_numbers = #tpu.dot_dimension_numbers<[1], [1], [0], [0], [0, 0, 1, 0], [], []>} : vector<2x32xf32>, vector<16x32xf32>, vector<2x16xf32> -> vector<2x16xf32>
    %9 = vector.broadcast %7 : vector<1x16xf32> to vector<2x16xf32>
    %10 = arith.addf %8, %9 : vector<2x16xf32>
    %c0_10 = arith.constant 0 : index
    %c0_11 = arith.constant 0 : index
    %11 = vector.load %arg10[%c0_10, %c0_11] : memref<2x16xf32, #tpu.memory_space<vmem>>, vector<2x16xf32>
    tpu.vector_store %arg10[%c0_10, %c0_11], %10 {strides = array<i32>} : memref<2x16xf32, #tpu.memory_space<vmem>>, vector<2x16xf32>,
    %c0_12 = arith.constant 0 : index
    %c0_13 = arith.constant 0 : index
    %12 = vector.load %arg6[%c0_12, %c0_13] : memref<8x32xf32, #tpu.memory_space<vmem>>, vector<8x32xf32>
    %c0_14 = arith.constant 0 : index
    %c0_15 = arith.constant 0 : index
    %13 = vector.load %arg7[%c0_14, %c0_15] : memref<1x8xf32, #tpu.memory_space<vmem>>, vector<1x8xf32>
    %cst_16 = arith.constant dense<0.000000e+00> : vector<2x8xf32>
    %14 = tpu.matmul %5, %12, %cst_16 {dimension_numbers = #tpu.dot_dimension_numbers<[1], [1], [0], [0], [0, 0, 1, 0], [], []>} : vector<2x32xf32>, vector<8x32xf32>, vector<2x8xf32> -> vector<2x8xf32>
    %15 = vector.broadcast %13 : vector<1x8xf32> to vector<2x8xf32>
    %16 = arith.addf %14, %15 : vector<2x8xf32>
    %c0_17 = arith.constant 0 : index
    %c0_18 = arith.constant 0 : index
    %17 = vector.load %arg11[%c0_17, %c0_18] : memref<2x8xf32, #tpu.memory_space<vmem>>, vector<2x8xf32>
    tpu.vector_store %arg11[%c0_17, %c0_18], %16 {strides = array<i32>} : memref<2x8xf32, #tpu.memory_space<vmem>>, vector<2x8xf32>,
    %c0_19 = arith.constant 0 : index
    %c0_20 = arith.constant 0 : index
    %18 = vector.load %arg8[%c0_19, %c0_20] : memref<4x32xf32, #tpu.memory_space<vmem>>, vector<4x32xf32>
    %c0_21 = arith.constant 0 : index
    %c0_22 = arith.constant 0 : index
    %19 = vector.load %arg9[%c0_21, %c0_22] : memref<1x4xf32, #tpu.memory_space<vmem>>, vector<1x4xf32>
    %cst_23 = arith.constant dense<0.000000e+00> : vector<2x4xf32>
    %20 = tpu.matmul %5, %18, %cst_23 {dimension_numbers = #tpu.dot_dimension_numbers<[1], [1], [0], [0], [0, 0, 1, 0], [], []>} : vector<2x32xf32>, vector<4x32xf32>, vector<2x4xf32> -> vector<2x4xf32>
    %21 = vector.broadcast %19 : vector<1x4xf32> to vector<2x4xf32>
    %22 = arith.addf %20, %21 : vector<2x4xf32>
    %c0_24 = arith.constant 0 : index
    %c0_25 = arith.constant 0 : index
    %23 = vector.load %arg12[%c0_24, %c0_25] : memref<2x4xf32, #tpu.memory_space<vmem>>, vector<2x4xf32>
    tpu.vector_store %arg12[%c0_24, %c0_25], %22 {strides = array<i32>} : memref<2x4xf32, #tpu.memory_space<vmem>>, vector<2x4xf32>,
    return
  }
  func.func @transform_0(%arg0: i32) -> (i32, i32) {
    %c0_i32 = arith.constant 0 : i32
    %c0_i32_0 = arith.constant 0 : i32
    return %arg0, %c0_i32 : i32, i32
  }
  func.func @transform_1(%arg0: i32) -> (i32, i32) {
    %c0_i32 = arith.constant 0 : i32
    %c0_i32_0 = arith.constant 0 : i32
    %c0_i32_1 = arith.constant 0 : i32
    return %c0_i32, %c0_i32_0 : i32, i32
  }
  func.func @transform_2(%arg0: i32) -> (i32, i32) {
    %c0_i32 = arith.constant 0 : i32
    %c0_i32_0 = arith.constant 0 : i32
    %c0_i32_1 = arith.constant 0 : i32
    return %c0_i32, %c0_i32_0 : i32, i32
  }
  func.func @transform_3(%arg0: i32) -> (i32, i32) {
    %c0_i32 = arith.constant 0 : i32
    %c0_i32_0 = arith.constant 0 : i32
    %c0_i32_1 = arith.constant 0 : i32
    return %c0_i32, %c0_i32_0 : i32, i32
  }
  func.func @transform_4(%arg0: i32) -> (i32, i32) {
    %c0_i32 = arith.constant 0 : i32
    %c0_i32_0 = arith.constant 0 : i32
    %c0_i32_1 = arith.constant 0 : i32
    return %c0_i32, %c0_i32_0 : i32, i32
  }
  func.func @transform_5(%arg0: i32) -> (i32, i32) {
    %c0_i32 = arith.constant 0 : i32
    %c0_i32_0 = arith.constant 0 : i32
    %c0_i32_1 = arith.constant 0 : i32
    return %c0_i32, %c0_i32_0 : i32, i32
  }
  func.func @transform_6(%arg0: i32) -> (i32, i32) {
    %c0_i32 = arith.constant 0 : i32
    %c0_i32_0 = arith.constant 0 : i32
    %c0_i32_1 = arith.constant 0 : i32
    return %c0_i32, %c0_i32_0 : i32, i32
  }
  func.func @transform_7(%arg0: i32) -> (i32, i32) {
    %c0_i32 = arith.constant 0 : i32
    %c0_i32_0 = arith.constant 0 : i32
    %c0_i32_1 = arith.constant 0 : i32
    return %c0_i32, %c0_i32_0 : i32, i32
  }
  func.func @transform_8(%arg0: i32) -> (i32, i32) {
    %c0_i32 = arith.constant 0 : i32
    %c0_i32_0 = arith.constant 0 : i32
    %c0_i32_1 = arith.constant 0 : i32
    return %c0_i32, %c0_i32_0 : i32, i32
  }
  func.func @transform_9(%arg0: i32) -> (i32, i32) {
    %c0_i32 = arith.constant 0 : i32
    %c0_i32_0 = arith.constant 0 : i32
    return %arg0, %c0_i32 : i32, i32
  }
  func.func @transform_10(%arg0: i32) -> (i32, i32) {
    %c0_i32 = arith.constant 0 : i32
    %c0_i32_0 = arith.constant 0 : i32
    return %arg0, %c0_i32 : i32, i32
  }
  func.func @transform_11(%arg0: i32) -> (i32, i32) {
    %c0_i32 = arith.constant 0 : i32
    %c0_i32_0 = arith.constant 0 : i32
    return %arg0, %c0_i32 : i32, i32
  }
}

</mosaic_0001>

<bundles_post_ra>
// kernel: tpu_custom_call.1
= control target key start
LH: loop header
LB: loop body
LE: loop exit
PB: predicated region body
PF: predicated region fallthrough
CT: control target
= control target key end

     0   :  { %17 = vsyncpa [#allocation3], 0  ;;  %s872_s0 = inlined_call_operand.hbm [shape: f32[2,32], index: 0, kind: input, shape index: {}]   ;;  %s873_s1 = inlined_call_operand.hbm [shape: f32[32,32], index: 1, kind: input, shape index: {}]   ;;  %s874_s2 = inlined_call_operand.vmem [shape: f32[1,32], index: 2, kind: input, shape index: {}]   ;;  %s875_s3 = inlined_call_operand.hbm [shape: f32[16,32], index: 3, kind: input, shape index: {}]   ;;  %s876_s4 = inlined_call_operand.vmem [shape: f32[1,16], index: 4, kind: input, shape index: {}]   ;;  %s877_s5 = inlined_call_operand.vmem [shape: f32[8,32], index: 5, kind: input, shape index: {}]   ;;  %s878_s6 = inlined_call_operand.vmem [shape: f32[1,8], index: 6, kind: input, shape index: {}]   ;;  %s879_s7 = inlined_call_operand.vmem [shape: f32[4,32], index: 7, kind: input, shape index: {}]   ;;  %s880_s8 = inlined_call_operand.vmem [shape: f32[1,4], index: 8, kind: input, shape index: {}]   ;;  %s881_s9 = inlined_call_operand.hbm [shape: f32[2,16], index: 9, kind: output, shape index: {0}]   ;;  %s882_s10 = inlined_call_operand.hbm [shape: f32[2,8], index: 10, kind: output, shape index: {1}]   ;;  %s883_s11 = inlined_call_operand.hbm [shape: f32[2,4], index: 11, kind: output, shape index: {2}]  }
   0x1   :  { %18 = vsyncpa [#allocation6], 0 }
   0x2   :  { %19 = vsyncpa [#allocation4], 0 }
   0x3   :  { %20 = vsyncpa [#allocation10], 0  ;;  %s692_s17 = smov [#allocation5]   ;;  %s552_s21 = scalar_lea.hbm %s873_s1, 512 }
   0x4   :  { %s36_s18 = sshll.u32 %s692_s17, 4  ;;  %p553_p0 = scmp.ne.s32.totalorder %s873_s1, %s552_s21  ;;  %s37_s18 = int_to_ptr.vmem [resolvable:$true] %s36_s18 }
   0x5   :  { %p556_p1 = scmp.lt.u32.totalorder %s552_s21, %s873_s1 }
   0x7   :  { %p558_p2 = pnand %p556_p1, %p553_p0 }
   0x9   :  { %561 = shalt.err (!%p558_p2)
}
   0xa   :  { %s562_s26 = scalar_lea.vmem %s37_s18, 512  ;;  %p567_p4 = scmp.lt.s32.totalorder %s37_s18, %s37_s18 }
   0xb   :  { %p563_p3 = scmp.ne.s32.totalorder %s37_s18, %s562_s26  ;;  %p568_p5 = scmp.lt.s32.totalorder %s562_s26, %s562_s26 }
   0xd   :  { %p569_p6 = por %p568_p5, %p567_p4 }
   0xf   :  { %p570_p7 = pnand %p569_p6, %p563_p3 }
  0x11   :  { %573 = shalt.err (!%p570_p7)
}
  0x12   :  { %s693_s27 = smov 128   ;;  %s694_s28 = smov 8  }
  0x13   :  { %42 = dma.hbm_to_vmem [thread:$0]  %s873_s1, 512, %s37_s18, [#allocation6], %s693_s27, %s693_s27, %s694_s28  }
  0x14   :  { %s695_s12 = smov [#allocation2]   ;;  %s696_s14 = smov [#allocation7]  }
  0x15   :  { %s27_s13 = sshll.u32 %s695_s12, 4  ;;  %s50_s15 = sshll.u32 %s696_s14, 4  ;;  %s28_s13 = int_to_ptr.vmem [resolvable:$true] %s27_s13  ;;  %s51_s15 = int_to_ptr.vmem [resolvable:$true] %s50_s15 }
  0x16   :  { %s574_s19 = scalar_lea.hbm %s872_s0, 32 }
  0x17   :  { %p575_p8 = scmp.ne.s32.totalorder %s872_s0, %s574_s19  ;;  %p578_p9 = scmp.lt.u32.totalorder %s574_s19, %s872_s0 }
  0x19   :  { %p580_p10 = pnand %p578_p9, %p575_p8 }
  0x1b   :  { %583 = shalt.err (!%p580_p10)
}
  0x1c   :  { %s584_s1 = scalar_lea.vmem %s28_s13, 32  ;;  %p589_p12 = scmp.lt.s32.totalorder %s28_s13, %s28_s13 }
  0x1d   :  { %p585_p11 = scmp.ne.s32.totalorder %s28_s13, %s584_s1  ;;  %p590_p13 = scmp.lt.s32.totalorder %s584_s1, %s584_s1 }
  0x1f   :  { %p591_p0 = por %p590_p13, %p589_p12 }
  0x21   :  { %p592_p1 = pnand %p591_p0, %p585_p11 }
  0x23   :  { %595 = shalt.err (!%p592_p1)
}
  0x24   :  { %30 = dma.hbm_to_vmem [thread:$0]  %s872_s0, 32, %s28_s13, [#allocation3]  }
  0x25   :  { %s596_s29 = scalar_lea.hbm %s875_s3, 256 }
  0x26   :  { %p597_p2 = scmp.ne.s32.totalorder %s875_s3, %s596_s29  ;;  %p600_p3 = scmp.lt.u32.totalorder %s596_s29, %s875_s3 }
  0x28   :  { %p602_p4 = pnand %p600_p3, %p597_p2 }
  0x2a   :  { %605 = shalt.err (!%p602_p4)
}
  0x2b   :  { %s606_s17 = scalar_lea.vmem %s51_s15, 256  ;;  %p611_p6 = scmp.lt.s32.totalorder %s51_s15, %s51_s15 }
  0x2c   :  { %p607_p5 = scmp.ne.s32.totalorder %s51_s15, %s606_s17  ;;  %p612_p7 = scmp.lt.s32.totalorder %s606_s17, %s606_s17 }
  0x2e   :  { %p613_p8 = por %p612_p7, %p611_p6 }
  0x30   :  { %p614_p9 = pnand %p613_p8, %p607_p5 }
  0x32   :  { %617 = shalt.err (!%p614_p9)
}
  0x33   :  { %56 = dma.hbm_to_vmem [thread:$0]  %s875_s3, 256, %s51_s15, [#allocation6], %s693_s27, %s693_s27, %s694_s28  }
  0x34   :  { %684 = dma.done.wait [#allocation3], 32  }
  0x35   :  { %685 = vsyncadd [#allocation3], 4294967264 }
  0x36   :  { %686 = dma.done.wait [#allocation6], 768  }
  0x37   :  { %687 = vsyncadd [#allocation6], 4294966528  ;;  %v697_v0 = vmov 0.0|0.0   ;;  %vm698_vm0 = vmmov 0   ;;  %v699_v1 = vmov 0.0   ;;  %vm88_vm1 = vcmask 261120  }
  0x38   :  { %529 = vmatprep.subr.bf16.mxu0 %v697_v0  ;;  %509 = vmatprep.mubr.msk.f32.mxu0 %vm698_vm0, %v699_v1  ;;  %v77_v2 = vld [vmem:[#allocation5] sm:$0xff]  ;;  %v78_v3 = vld [vmem:[#allocation5 + $0x8] sm:$0xff]  ;;  %vm531_vm2 = vmpackc.low %vm88_vm1, %vm88_vm1  ;;  %s700_s21 = smov [#allocation8]   ;;  %vm262_vm3 = vcmask 123904   ;;  %s701_s1 = smov [#allocation9]   ;;  %vm345_vm4 = vcmask 58368  }
  0x39   :  { %537 = vmatprep.subr.bf16.mxu1 %v697_v0  ;;  %516 = vmatprep.mubr.msk.f32.mxu1 %vm698_vm0, %v699_v1  ;;  %v530_v4 = vpack.c.bf16 %v78_v3, %v77_v2  ;;  %v174_v5 = vld [vmem:[#allocation7] sm:$0xff]  ;;  %v175_v6 = vld [vmem:[#allocation7 + $0x8] sm:$0xff]  ;;  %v79_v8 = vld [vmem:[#allocation5 + $0x10] sm:$0xff]  ;;  %s436_s22 = sshll.u32 %s700_s21, 4  ;;  %s446_s18 = sshll.u32 %s701_s1, 4  ;;  %s437_s22 = int_to_ptr.vmem [resolvable:$true] %s436_s22  ;;  %s447_s18 = int_to_ptr.vmem [resolvable:$true] %s446_s18 }
  0x3a   :  { %v538_v7 = vpack.c.bf16 %v175_v6, %v174_v5  ;;  %v80_v9 = vld [vmem:[#allocation5 + $0x18] sm:$0xff]  ;;  %v473_v12 = vld [vmem:[%s874_s2] ss:$0 sm:$0xff]  ;;  %s618_s24 = scalar_lea.vmem %s437_s22, 32  ;;  %p623_p11 = scmp.lt.s32.totalorder %s437_s22, %s437_s22 }
  0x3b   :  { %532 = vmatpush3.bf16.xpose.msk.msra.mxu0 %vm531_vm2, %v530_v4  ;;  %v534_v10 = vpack.c.bf16 %v80_v9, %v79_v8  ;;  %v76_v11 = vld [vmem:[#allocation2] sm:$0x3]  ;;  %v264_v16 = vld [vmem:[%s877_s5] sm:$0xff]  ;;  %p619_p10 = scmp.ne.s32.totalorder %s437_s22, %s618_s24  ;;  %p624_p12 = scmp.lt.s32.totalorder %s618_s24, %s618_s24 }
  0x3c   :  { %533 = vmatprep.subr.bf16.mxu0 %v697_v0  ;;  %540 = vmatpush3.bf16.xpose.msk.msra.mxu1 %vm531_vm2, %v538_v7  ;;  %v347_v17 = vld [vmem:[%s879_s7] sm:$0xf] }
  0x3d   :  { %519 = vmatprep.subr.mxu1 %v699_v1  ;;  %v479_v18 = vld [vmem:[%s876_s4] ss:$0 sm:$0xff]  ;;  %p625_p13 = por %p624_p12, %p623_p11 }
  0x3e   :  { %v483_v22 = vld [vmem:[%s878_s6] ss:$0 sm:$0xff] }
  0x3f   :  { %p626_p0 = pnand %p625_p13, %p619_p10 }
  0x43   :  { %536 = vmatpush3.bf16.xpose.msk.msra.mxu0 %vm531_vm2, %v534_v10 }
  0x4a   :  { %510 = vmatmul.mubr.msk.f32.vlgmr.msra.gmra.mrb[0].mxu0 %vm88_vm1, %v76_v11 }
 0x11d   :  { %v170_v13 = vpop.f32.mrb[0].mxu0 }
 0x11e   :  { %v171_v14 = vadd.f32 %v473_v12, %v170_v13  ;;  %v511_v15 = vpop.f32.mrb[1].mxu0 }
 0x120   :  { %517 = vmatmul.mubr.msk.f32.vlgmr.msra.gmra.mrb[0].mxu1 %vm88_vm1, %v171_v14 }
 0x121   :  { %520 = vmatpush3.xpose.msk.msra.mxu1 %vm88_vm1, %v264_v16  ;;  %521 = vmatprep.mubr.msk.f32.mxu1 %vm698_vm0, %v699_v1 }
 0x122   :  { %524 = vmatprep.subr.mxu1 %v699_v1 }
 0x124   :  { %522 = vmatmul.mubr.msk.f32.vlgmr.msra.gmra.mrb[2].mxu1 %vm88_vm1, %v171_v14 }
 0x125   :  { %525 = vmatpush3.xpose.msk.msra.mxu1 %vm88_vm1, %v347_v17  ;;  %526 = vmatprep.mubr.msk.f32.mxu1 %vm698_vm0, %v699_v1 }
 0x128   :  { %527 = vmatmul.mubr.msk.f32.vlgmr.msra.gmra.mrb[4].mxu1 %vm88_vm1, %v171_v14 }
 0x1f3   :  { %v258_v19 = vpop.f32.mrb[0].mxu1 }
 0x1f4   :  { %v259_v20 = vadd.f32 %v479_v18, %v258_v19  ;;  %v518_v21 = vpop.f32.mrb[1].mxu1 }
 0x1f6   :  { %263 = vst.msk [vmem:[#allocation8] sm:$0x3] %vm262_vm3, %v259_v20 }
 0x1f7   :  { %v341_v23 = vpop.f32.mrb[2].mxu1 }
 0x1f8   :  { %629 = shalt.err (!%p626_p0)
}
 0x1f9   :  { %s630_s26 = scalar_lea.hbm %s881_s9, 32 }
 0x1fa   :  { %p631_p1 = scmp.ne.s32.totalorder %s881_s9, %s630_s26  ;;  %p634_p2 = scmp.lt.u32.totalorder %s630_s26, %s881_s9 }
 0x1fc   :  { %p636_p3 = pnand %p634_p2, %p631_p1 }
 0x1fe   :  { %639 = shalt.err (!%p636_p3)
}
 0x1ff   :  { %439 = dma.vmem_to_hbm [thread:$0]  %s437_s22, 32, %s881_s9, [#allocation4]   ;;  %v342_v24 = vadd.f32 %v483_v22, %v341_v23  ;;  %v523_v25 = vpop.f32.mrb[3].mxu1  ;;  %v486_v26 = vld [vmem:[%s880_s8] ss:$0 sm:$0xff] }
 0x200   :  { %s702_s13 = smov [#allocation11]   ;;  %v424_v27 = vpop.f32.mrb[4].mxu1  ;;  %s640_s27 = scalar_lea.vmem %s447_s18, 32 }
 0x201   :  { %s456_s3 = sshll.u32 %s702_s13, 4  ;;  %346 = vst.msk [vmem:[#allocation9] sm:$0x3] %vm345_vm4, %v342_v24  ;;  %p641_p4 = scmp.ne.s32.totalorder %s447_s18, %s640_s27  ;;  %s457_s3 = int_to_ptr.vmem [resolvable:$true] %s456_s3 }
 0x202   :  { %p645_p5 = scmp.lt.s32.totalorder %s447_s18, %s447_s18  ;;  %p646_p6 = scmp.lt.s32.totalorder %s640_s27, %s640_s27 }
 0x204   :  { %p647_p7 = por %p646_p6, %p645_p5 }
 0x206   :  { %p648_p8 = pnand %p647_p7, %p641_p4 }
 0x208   :  { %651 = shalt.err (!%p648_p8)
}
 0x209   :  { %s652_s15 = scalar_lea.hbm %s882_s10, 32 }
 0x20a   :  { %p653_p9 = scmp.ne.s32.totalorder %s882_s10, %s652_s15  ;;  %p656_p10 = scmp.lt.u32.totalorder %s652_s15, %s882_s10 }
 0x20c   :  { %p658_p11 = pnand %p656_p10, %p653_p9 }
 0x20e   :  { %661 = shalt.err (!%p658_p11)
}
 0x20f   :  { %449 = dma.vmem_to_hbm [thread:$0]  %s447_s18, 32, %s882_s10, [#allocation10]   ;;  %vm428_vm5 = vcmask 25600   ;;  %v425_v28 = vadd.f32 %v486_v26, %v424_v27  ;;  %v528_v29 = vpop.f32.mrb[5].mxu1 }
 0x210   :  { %s662_s22 = scalar_lea.vmem %s457_s3, 32  ;;  %p667_p13 = scmp.lt.s32.totalorder %s457_s3, %s457_s3 }
 0x211   :  { %429 = vst.msk [vmem:[#allocation11] sm:$0x3] %vm428_vm5, %v425_v28  ;;  %p663_p12 = scmp.ne.s32.totalorder %s457_s3, %s662_s22  ;;  %p668_p0 = scmp.lt.s32.totalorder %s662_s22, %s662_s22 }
 0x213   :  { %p669_p1 = por %p668_p0, %p667_p13 }
 0x215   :  { %p670_p2 = pnand %p669_p1, %p663_p12 }
 0x217   :  { %673 = shalt.err (!%p670_p2)
}
 0x218   :  { %s674_s1 = scalar_lea.hbm %s883_s11, 32 }
 0x219   :  { %p675_p3 = scmp.ne.s32.totalorder %s883_s11, %s674_s1  ;;  %p678_p4 = scmp.lt.u32.totalorder %s674_s1, %s883_s11 }
 0x21b   :  { %p680_p5 = pnand %p678_p4, %p675_p3 }
 0x21d   :  { %683 = shalt.err (!%p680_p5)
}
 0x21e   :  { %459 = dma.vmem_to_hbm [thread:$0]  %s457_s3, 32, %s883_s11, [#allocation10]  }
 0x21f   :  { %688 = dma.done.wait [#allocation4], 32  }
 0x220   :  { %689 = vsyncadd [#allocation4], 4294967264 }
 0x221   :  { %690 = dma.done.wait [#allocation10], 64  }
 0x222   :  { %691 = vsyncadd [#allocation10], 4294967232 }
 0x223   :  { %469 = vsyncpa [#allocation3], 1 }
 0x224   :  { %470 = vsyncpa [#allocation6], 1 }
 0x225   :  { %471 = vsyncpa [#allocation4], 1 }
 0x226   :  { %472 = vsyncpa [#allocation10], 1 }

</bundles_post_ra>
